<compile_context>
chip_gen: v6e
topology: v6e:2x2x1
jax: 0.10.0
libtpu: 0.0.40
codegen_flags: <defaults>
</compile_context>

<pallas_src>
import jax
import jax.numpy as jnp
from jax import lax
from jax.experimental import pallas as pl
from jax.experimental.pallas import tpu as pltpu


def _round_up(x, m):
    return ((x + m - 1) // m) * m


def _device_kind():
    try:
        return jax.devices()[0].device_kind.lower()
    except Exception:
        return ""


# -----------------------------------------------------------------------------
# Pallas kernel: in-kernel one-hot + fused (emb|z) Linear + 2x (Linear,Tanh)
# + final Linear.  Activation dtype is implied by the hidden-bias dtype.
# -----------------------------------------------------------------------------
def _gen_kernel(c_ref, z_ref,
                w1_ref, b1_ref,
                w2_ref, b2_ref,
                w3_ref, b3_ref,
                w4_ref, b4_ref,
                out_ref):
    block_b = c_ref.shape[0]
    noise_dim = z_ref.shape[1]
    out_pad = w1_ref.shape[0] - noise_dim        # padded one-hot width

    # One-hot for the class ids, built in-register (no HBM round trip).
    # Note: out-of-range c silently yields an all-zero "embedding" row.
    cls = c_ref[...]                                              # (block_b, 1) i32
    iota = lax.broadcasted_iota(jnp.int32, (block_b, out_pad), 1)
    onehot = (iota == cls).astype(jnp.bfloat16)                   # (block_b, out_pad)

    # Fused layer-1 input: [onehot(c) | z] — single MXU pass over stacked W1.
    x = jnp.concatenate([onehot, z_ref[...]], axis=-1)            # (block_b, out_pad+noise)

    def hidden(x_bf, w_ref, b_ref):
        y = jnp.dot(x_bf, w_ref[...], preferred_element_type=jnp.float32)
        y = y.astype(b_ref.dtype) + b_ref[...]   # bf16 epilogue on v6e/v7x, f32 on v5e
        return jnp.tanh(y).astype(jnp.bfloat16)
        # TODO(synk): training-mode dropout would use pltpu.prng_seed +
        #             pltpu.prng_random_bits per batch tile (identity in eval).

    h = hidden(x, w1_ref, b1_ref)
    h = hidden(h, w2_ref, b2_ref)
    h = hidden(h, w3_ref, b3_ref)

    out_ref[...] = (jnp.dot(h, w4_ref[...], preferred_element_type=jnp.float32)
                    + b4_ref[...])


# -----------------------------------------------------------------------------
# One-time parameter preparation:
#   * fold emb into W1, pad its rows to a 16 multiple, stack with the z-rows
#   * pad hidden-1 64 -> 128 (W1 cols, b1, W2 rows)
#   * bf16 weights; hidden biases in the activation dtype; f32 final bias
#   * lane-pad the output projection to a multiple of 128
# -----------------------------------------------------------------------------
def prepare_params(params, act_dtype=None):
    if act_dtype is None:
        kind = _device_kind()
        act_dtype = jnp.bfloat16 if ("v6" in kind or "v7" in kind) else jnp.float32

    out_dim = params["emb"].shape[0]
    feat_dim = params["w4"].shape[1]
    feat_pad = _round_up(feat_dim, 128)
    out_pad = _round_up(out_dim, 16)
    h1 = params["w1"].shape[1]                    # 64
    h1_pad = _round_up(h1, 128)                   # 128

    w1 = params["w1"].astype(jnp.float32)         # (out_dim + noise_dim, 64)
    w1e = w1[:out_dim]                            # rows multiplying emb(c)
    w1z = w1[out_dim:]                            # rows multiplying z
    emb_w1 = params["emb"].astype(jnp.float32) @ w1e          # (out_dim, 64)
    emb_w1 = jnp.pad(emb_w1, ((0, out_pad - out_dim), (0, 0)))
    w1_full = jnp.concatenate([emb_w1, w1z], axis=0)           # (out_pad+noise, 64)
    w1_full = jnp.pad(w1_full, ((0, 0), (0, h1_pad - h1)))     # lane-dense h1

    b1 = jnp.pad(params["b1"], (0, h1_pad - h1))
    w2 = jnp.pad(params["w2"], ((0, h1_pad - h1), (0, 0)))     # (128, 128)
    w4 = jnp.pad(params["w4"], ((0, 0), (0, feat_pad - feat_dim)))
    b4 = jnp.pad(params["b4"], (0, feat_pad - feat_dim))

    bf = jnp.bfloat16
    return {
        "w1": w1_full.astype(bf),                  # (out_pad + noise_dim, 128)
        "b1": b1[None, :].astype(act_dtype),
        "w2": w2.astype(bf),                       # (128, 128)
        "b2": params["b2"][None, :].astype(act_dtype),
        "w3": params["w3"].astype(bf),             # (128, 256)
        "b3": params["b3"][None, :].astype(act_dtype),
        "w4": w4.astype(bf),                       # (256, feat_pad)
        "b4": b4[None, :].astype(jnp.float32),
        "out_dim": out_dim,
        "out_pad": out_pad,
        "feat_dim": feat_dim,
    }


# -----------------------------------------------------------------------------
# Wrapper: batch-tiled grid (16-row multiples, 1 tile on v5e/v6e, 2 on v7x for
# larger batches), full-array weight blocks, lane-dense f32 output.
# -----------------------------------------------------------------------------
def fedppd_con_generator_forward(z, c, prepped, *, max_block_b=1024, num_tiles=None):
    B, noise_dim = z.shape
    feat_dim = prepped["feat_dim"]
    feat_pad = prepped["w4"].shape[1]

    if num_tiles is None:
        kind = _device_kind()
        num_tiles = 2 if ("v7" in kind and B > 16) else 1

    # Batch tile: multiple of 16 (bf16 sublane pack), sized so the grid has
    # `num_tiles` steps without a mostly-padding last tile.
    b16 = _round_up(max(B, 1), 16)
    block_b = min(max_block_b, _round_up(pl.cdiv(b16, num_tiles), 16))
    bp = _round_up(b16, block_b)

    c2d = c.astype(jnp.int32)[:, None]                 # (B, 1)
    z_bf = z.astype(jnp.bfloat16)                      # halve per-row input DMA
    if bp != B:
        c2d = jnp.pad(c2d, ((0, bp - B), (0, 0)))
        z_bf = jnp.pad(z_bf, ((0, bp - B), (0, 0)))

    def full_spec(x):
        return pl.BlockSpec(x.shape, lambda i: (0, 0))

    in_specs = [
        pl.BlockSpec((block_b, 1), lambda i: (i, 0)),            # c
        pl.BlockSpec((block_b, noise_dim), lambda i: (i, 0)),    # z (bf16)
        full_spec(prepped["w1"]), full_spec(prepped["b1"]),
        full_spec(prepped["w2"]), full_spec(prepped["b2"]),
        full_spec(prepped["w3"]), full_spec(prepped["b3"]),
        full_spec(prepped["w4"]), full_spec(prepped["b4"]),
    ]
    out_spec = pl.BlockSpec((block_b, feat_pad), lambda i: (i, 0))

    out = pl.pallas_call(
        _gen_kernel,
        out_shape=jax.ShapeDtypeStruct((bp, feat_pad), jnp.float32),
        grid=(bp // block_b,),
        in_specs=in_specs,
        out_specs=out_spec,
        compiler_params=pltpu.CompilerParams(
            dimension_semantics=("parallel",)),        # lets v7x use both TCs
    )(c2d, z_bf,
      prepped["w1"], prepped["b1"],
      prepped["w2"], prepped["b2"],
      prepped["w3"], prepped["b3"],
      prepped["w4"], prepped["b4"])

    return out[:B, :feat_dim]


# -----------------------------------------------------------------------------
# Deterministic parameter init (mimics PyTorch defaults, synthetic weights)
# -----------------------------------------------------------------------------
def init_params(key, noise_dim, feat_dim, out_dim):
    dims = [noise_dim + out_dim, 64, 128, 256]
    keys = jax.random.split(key, 16)
    params = {}
    # nn.Embedding default: N(0, 1)
    params["emb"] = jax.random.normal(keys[0], (out_dim, out_dim), jnp.float32)

    def linear(kw, kb, d_in, d_out):
        bound = 1.0 / jnp.sqrt(d_in)
        w = jax.random.uniform(kw, (d_in, d_out), jnp.float32, -bound, bound)
        b = jax.random.uniform(kb, (d_out,), jnp.float32, -bound, bound)
        return w, b

    params["w1"], params["b1"] = linear(keys[1], keys[2], dims[0], dims[1])
    params["w2"], params["b2"] = linear(keys[3], keys[4], dims[1], dims[2])
    params["w3"], params["b3"] = linear(keys[5], keys[6], dims[2], dims[3])
    params["w4"], params["b4"] = linear(keys[7], keys[8], dims[3], feat_dim)
    return params


# Pure-JAX f32 reference for a sanity check.
def reference_forward(z, c, params):
    emb = params["emb"][c]                       # embedding lookup
    zc = jnp.concatenate([emb, z], axis=-1)
    h = jnp.tanh(zc @ params["w1"] + params["b1"])
    h = jnp.tanh(h @ params["w2"] + params["b2"])
    h = jnp.tanh(h @ params["w3"] + params["b3"])
    return h @ params["w4"] + params["b4"]


if __name__ == "__main__":
    noise_dim, feat_dim, out_dim = 32, 32, 10
    batch = 8

    key = jax.random.PRNGKey(0)
    k_param, k_z, k_c = jax.random.split(key, 3)

    params = init_params(k_param, noise_dim, feat_dim, out_dim)
    prepped = prepare_params(params)               # one-time prep, not per call

    z = jax.random.normal(k_z, (batch, noise_dim), jnp.float32)
    c = jax.random.randint(k_c, (batch,), 0, out_dim, jnp.int32)

    out = fedppd_con_generator_forward(z, c, prepped)
    out = jax.block_until_ready(out)

    ref = reference_forward(z, c, params)
    assert out.shape == (batch, feat_dim)
    # bf16 operands / activations with f32 accumulation -> relaxed tolerance.
    assert jnp.allclose(out, ref, atol=1e-1, rtol=5e-2), "mismatch vs reference"

    print("KERNEL_OK")
</pallas_src>

<mosaic_0001>
module attributes {stable_mosaic.version = 11 : i64} {
  func.func @_gen_kernel(%arg0: i32, %arg1: memref<16x1xi32, #tpu.memory_space<vmem>>, %arg2: memref<16x32xbf16, #tpu.memory_space<vmem>>, %arg3: memref<48x128xbf16, #tpu.memory_space<vmem>>, %arg4: memref<1x128xf32, #tpu.memory_space<vmem>>, %arg5: memref<128x128xbf16, #tpu.memory_space<vmem>>, %arg6: memref<1x128xf32, #tpu.memory_space<vmem>>, %arg7: memref<128x256xbf16, #tpu.memory_space<vmem>>, %arg8: memref<1x256xf32, #tpu.memory_space<vmem>>, %arg9: memref<256x128xbf16, #tpu.memory_space<vmem>>, %arg10: memref<1x128xf32, #tpu.memory_space<vmem>>, %arg11: memref<16x128xf32, #tpu.memory_space<vmem>>) attributes {dimension_semantics = [#tpu.dimension_semantics<parallel>], iteration_bounds = array<i64: 1>, scalar_prefetch = 0 : i64, scratch_operands = 0 : i64, tpu.core_type = #tpu.core_type<tc>, window_params = [{transform_indices = @transform_0, window_bounds = array<i64: 16, 1>}, {transform_indices = @transform_1, window_bounds = array<i64: 16, 32>}, {pipeline_mode = #tpu.pipeline_mode<synchronous>, transform_indices = @transform_2, window_bounds = array<i64: 48, 128>}, {pipeline_mode = #tpu.pipeline_mode<synchronous>, transform_indices = @transform_3, window_bounds = array<i64: 1, 128>}, {pipeline_mode = #tpu.pipeline_mode<synchronous>, transform_indices = @transform_4, window_bounds = array<i64: 128, 128>}, {pipeline_mode = #tpu.pipeline_mode<synchronous>, transform_indices = @transform_5, window_bounds = array<i64: 1, 128>}, {pipeline_mode = #tpu.pipeline_mode<synchronous>, transform_indices = @transform_6, window_bounds = array<i64: 128, 256>}, {pipeline_mode = #tpu.pipeline_mode<synchronous>, transform_indices = @transform_7, window_bounds = array<i64: 1, 256>}, {pipeline_mode = #tpu.pipeline_mode<synchronous>, transform_indices = @transform_8, window_bounds = array<i64: 256, 128>}, {pipeline_mode = #tpu.pipeline_mode<synchronous>, transform_indices = @transform_9, window_bounds = array<i64: 1, 128>}, {transform_indices = @transform_10, window_bounds = array<i64: 16, 128>}]} {
    %c0 = arith.constant 0 : index
    %c0_0 = arith.constant 0 : index
    %0 = vector.load %arg1[%c0, %c0_0] : memref<16x1xi32, #tpu.memory_space<vmem>>, vector<16x1xi32>
    %1 = tpu.iota {dimensions = array<i32: 1>} : vector<16x16xi32>
    %2 = vector.broadcast %0 : vector<16x1xi32> to vector<16x16xi32>
    %3 = arith.cmpi eq, %1, %2 : vector<16x16xi32>
    %4 = arith.extui %3 : vector<16x16xi1> to vector<16x16xi32>
    %5 = arith.sitofp %4 : vector<16x16xi32> to vector<16x16xf32>
    %6 = arith.truncf %5 : vector<16x16xf32> to vector<16x16xbf16>
    %c0_1 = arith.constant 0 : index
    %c0_2 = arith.constant 0 : index
    %7 = vector.load %arg2[%c0_1, %c0_2] : memref<16x32xbf16, #tpu.memory_space<vmem>>, vector<16x32xbf16>
    %8 = tpu.concatenate %6, %7 in 1 : vector<16x16xbf16>, vector<16x32xbf16> -> vector<16x48xbf16>
    %c0_3 = arith.constant 0 : index
    %c0_4 = arith.constant 0 : index
    %9 = vector.load %arg3[%c0_3, %c0_4] : memref<48x128xbf16, #tpu.memory_space<vmem>>, vector<48x128xbf16>
    %cst = arith.constant dense<0.000000e+00> : vector<16x128xf32>
    %10 = tpu.matmul %8, %9, %cst {dimension_numbers = #tpu.dot_dimension_numbers<[1], [0], [0], [1], [0, 0, 1, 1], [], []>} : vector<16x48xbf16>, vector<48x128xbf16>, vector<16x128xf32> -> vector<16x128xf32>
    %c0_5 = arith.constant 0 : index
    %c0_6 = arith.constant 0 : index
    %11 = vector.load %arg4[%c0_5, %c0_6] : memref<1x128xf32, #tpu.memory_space<vmem>>, vector<1x128xf32>
    %12 = vector.broadcast %11 : vector<1x128xf32> to vector<16x128xf32>
    %13 = arith.addf %10, %12 : vector<16x128xf32>
    %14 = math.tanh %13 : vector<16x128xf32>
    %15 = arith.truncf %14 : vector<16x128xf32> to vector<16x128xbf16>
    %c0_7 = arith.constant 0 : index
    %c0_8 = arith.constant 0 : index
    %16 = vector.load %arg5[%c0_7, %c0_8] : memref<128x128xbf16, #tpu.memory_space<vmem>>, vector<128x128xbf16>
    %cst_9 = arith.constant dense<0.000000e+00> : vector<16x128xf32>
    %17 = tpu.matmul %15, %16, %cst_9 {dimension_numbers = #tpu.dot_dimension_numbers<[1], [0], [0], [1], [0, 0, 1, 1], [], []>} : vector<16x128xbf16>, vector<128x128xbf16>, vector<16x128xf32> -> vector<16x128xf32>
    %c0_10 = arith.constant 0 : index
    %c0_11 = arith.constant 0 : index
    %18 = vector.load %arg6[%c0_10, %c0_11] : memref<1x128xf32, #tpu.memory_space<vmem>>, vector<1x128xf32>
    %19 = vector.broadcast %18 : vector<1x128xf32> to vector<16x128xf32>
    %20 = arith.addf %17, %19 : vector<16x128xf32>
    %21 = math.tanh %20 : vector<16x128xf32>
    %22 = arith.truncf %21 : vector<16x128xf32> to vector<16x128xbf16>
    %c0_12 = arith.constant 0 : index
    %c0_13 = arith.constant 0 : index
    %23 = vector.load %arg7[%c0_12, %c0_13] : memref<128x256xbf16, #tpu.memory_space<vmem>>, vector<128x256xbf16>
    %cst_14 = arith.constant dense<0.000000e+00> : vector<16x256xf32>
    %24 = tpu.matmul %22, %23, %cst_14 {dimension_numbers = #tpu.dot_dimension_numbers<[1], [0], [0], [1], [0, 0, 1, 1], [], []>} : vector<16x128xbf16>, vector<128x256xbf16>, vector<16x256xf32> -> vector<16x256xf32>
    %c0_15 = arith.constant 0 : index
    %c0_16 = arith.constant 0 : index
    %25 = vector.load %arg8[%c0_15, %c0_16] : memref<1x256xf32, #tpu.memory_space<vmem>>, vector<1x256xf32>
    %26 = vector.broadcast %25 : vector<1x256xf32> to vector<16x256xf32>
    %27 = arith.addf %24, %26 : vector<16x256xf32>
    %28 = math.tanh %27 : vector<16x256xf32>
    %29 = arith.truncf %28 : vector<16x256xf32> to vector<16x256xbf16>
    %c0_17 = arith.constant 0 : index
    %c0_18 = arith.constant 0 : index
    %30 = vector.load %arg9[%c0_17, %c0_18] : memref<256x128xbf16, #tpu.memory_space<vmem>>, vector<256x128xbf16>
    %cst_19 = arith.constant dense<0.000000e+00> : vector<16x128xf32>
    %31 = tpu.matmul %29, %30, %cst_19 {dimension_numbers = #tpu.dot_dimension_numbers<[1], [0], [0], [1], [0, 0, 1, 1], [], []>} : vector<16x256xbf16>, vector<256x128xbf16>, vector<16x128xf32> -> vector<16x128xf32>
    %c0_20 = arith.constant 0 : index
    %c0_21 = arith.constant 0 : index
    %32 = vector.load %arg10[%c0_20, %c0_21] : memref<1x128xf32, #tpu.memory_space<vmem>>, vector<1x128xf32>
    %33 = vector.broadcast %32 : vector<1x128xf32> to vector<16x128xf32>
    %34 = arith.addf %31, %33 : vector<16x128xf32>
    %c0_22 = arith.constant 0 : index
    %c0_23 = arith.constant 0 : index
    %35 = vector.load %arg11[%c0_22, %c0_23] : memref<16x128xf32, #tpu.memory_space<vmem>>, vector<16x128xf32>
    tpu.vector_store %arg11[%c0_22, %c0_23], %34 {strides = array<i32>} : memref<16x128xf32, #tpu.memory_space<vmem>>, vector<16x128xf32>,
    return
  }
  func.func @transform_0(%arg0: i32) -> (i32, i32) {
    %c0_i32 = arith.constant 0 : i32
    %c0_i32_0 = arith.constant 0 : i32
    return %arg0, %c0_i32 : i32, i32
  }
  func.func @transform_1(%arg0: i32) -> (i32, i32) {
    %c0_i32 = arith.constant 0 : i32
    %c0_i32_0 = arith.constant 0 : i32
    return %arg0, %c0_i32 : i32, i32
  }
  func.func @transform_2(%arg0: i32) -> (i32, i32) {
    %c0_i32 = arith.constant 0 : i32
    %c0_i32_0 = arith.constant 0 : i32
    %c0_i32_1 = arith.constant 0 : i32
    return %c0_i32, %c0_i32_0 : i32, i32
  }
  func.func @transform_3(%arg0: i32) -> (i32, i32) {
    %c0_i32 = arith.constant 0 : i32
    %c0_i32_0 = arith.constant 0 : i32
    %c0_i32_1 = arith.constant 0 : i32
    return %c0_i32, %c0_i32_0 : i32, i32
  }
  func.func @transform_4(%arg0: i32) -> (i32, i32) {
    %c0_i32 = arith.constant 0 : i32
    %c0_i32_0 = arith.constant 0 : i32
    %c0_i32_1 = arith.constant 0 : i32
    return %c0_i32, %c0_i32_0 : i32, i32
  }
  func.func @transform_5(%arg0: i32) -> (i32, i32) {
    %c0_i32 = arith.constant 0 : i32
    %c0_i32_0 = arith.constant 0 : i32
    %c0_i32_1 = arith.constant 0 : i32
    return %c0_i32, %c0_i32_0 : i32, i32
  }
  func.func @transform_6(%arg0: i32) -> (i32, i32) {
    %c0_i32 = arith.constant 0 : i32
    %c0_i32_0 = arith.constant 0 : i32
    %c0_i32_1 = arith.constant 0 : i32
    return %c0_i32, %c0_i32_0 : i32, i32
  }
  func.func @transform_7(%arg0: i32) -> (i32, i32) {
    %c0_i32 = arith.constant 0 : i32
    %c0_i32_0 = arith.constant 0 : i32
    %c0_i32_1 = arith.constant 0 : i32
    return %c0_i32, %c0_i32_0 : i32, i32
  }
  func.func @transform_8(%arg0: i32) -> (i32, i32) {
    %c0_i32 = arith.constant 0 : i32
    %c0_i32_0 = arith.constant 0 : i32
    %c0_i32_1 = arith.constant 0 : i32
    return %c0_i32, %c0_i32_0 : i32, i32
  }
  func.func @transform_9(%arg0: i32) -> (i32, i32) {
    %c0_i32 = arith.constant 0 : i32
    %c0_i32_0 = arith.constant 0 : i32
    %c0_i32_1 = arith.constant 0 : i32
    return %c0_i32, %c0_i32_0 : i32, i32
  }
  func.func @transform_10(%arg0: i32) -> (i32, i32) {
    %c0_i32 = arith.constant 0 : i32
    %c0_i32_0 = arith.constant 0 : i32
    return %arg0, %c0_i32 : i32, i32
  }
}

</mosaic_0001>

<bundles_post_ra>
// kernel: tpu_custom_call.1
= control target key start
LH: loop header
LB: loop body
LE: loop exit
PB: predicated region body
PF: predicated region fallthrough
CT: control target
= control target key end

     0   :  { %15 = vsyncpa [#allocation3], 0  ;;  %s1095_s0 = inlined_call_operand.vmem [shape: s32[16,1], index: 0, kind: input, shape index: {}]   ;;  %s1096_s1 = inlined_call_operand.vmem [shape: bf16[16,32], index: 1, kind: input, shape index: {}]   ;;  %s1097_s2 = inlined_call_operand.hbm [shape: bf16[48,128], index: 2, kind: input, shape index: {}]   ;;  %s1098_s3 = inlined_call_operand.vmem [shape: f32[1,128], index: 3, kind: input, shape index: {}]   ;;  %s1099_s4 = inlined_call_operand.hbm [shape: bf16[128,128], index: 4, kind: input, shape index: {}]   ;;  %s1100_s5 = inlined_call_operand.vmem [shape: f32[1,128], index: 5, kind: input, shape index: {}]   ;;  %s1101_s6 = inlined_call_operand.hbm [shape: bf16[128,256], index: 6, kind: input, shape index: {}]   ;;  %s1102_s7 = inlined_call_operand.vmem [shape: f32[1,256], index: 7, kind: input, shape index: {}]   ;;  %s1103_s8 = inlined_call_operand.hbm [shape: bf16[256,128], index: 8, kind: input, shape index: {}]   ;;  %s1104_s9 = inlined_call_operand.vmem [shape: f32[1,128], index: 9, kind: input, shape index: {}]   ;;  %s1105_s10 = inlined_call_operand.hbm [shape: f32[16,128], index: 10, kind: output, shape index: {}]  }
   0x1   :  { %16 = vsyncpa [#allocation6], 0 }
   0x2   :  { %17 = vsyncpa [#allocation9], 0 }
   0x3   :  { %18 = vsyncpa [#allocation4], 0  ;;  %s974_s13 = smov [#allocation5]   ;;  %s975_s15 = smov [#allocation2]  }
   0x4   :  { %s42_s14 = sshll.u32 %s974_s13, 4  ;;  %s28_s16 = sshll.u32 %s975_s15, 4  ;;  %s43_s14 = int_to_ptr.vmem [resolvable:$true] %s42_s14  ;;  %s29_s16 = int_to_ptr.vmem [resolvable:$true] %s28_s16 }
   0x5   :  { %s874_s17 = scalar_lea.vmem %s43_s14, 1024  ;;  %p879_p1 = scmp.lt.s32.totalorder %s43_s14, %s43_s14 }
   0x6   :  { %p875_p0 = scmp.ne.s32.totalorder %s43_s14, %s874_s17  ;;  %p880_p2 = scmp.lt.s32.totalorder %s874_s17, %s874_s17 }
   0x8   :  { %p881_p3 = por %p880_p2, %p879_p1 }
   0xa   :  { %p882_p4 = pnand %p881_p3, %p875_p0 }
   0xc   :  { %885 = shalt.err (!%p882_p4)
}
   0xd   :  { %s976_s18 = smov 64   ;;  %s977_s19 = smov 4  }
   0xe   :  { %48 = dma.hbm_to_vmem [thread:$0]  %s1099_s4, 1024, %s43_s14, [#allocation6], %s976_s18, %s976_s18, %s977_s19  }
   0xf   :  { %s894_s22 = scalar_lea.vmem %s29_s16, 384  ;;  %p899_p6 = scmp.lt.s32.totalorder %s29_s16, %s29_s16 }
  0x10   :  { %p895_p5 = scmp.ne.s32.totalorder %s29_s16, %s894_s22  ;;  %p900_p7 = scmp.lt.s32.totalorder %s894_s22, %s894_s22 }
  0x12   :  { %p901_p8 = por %p900_p7, %p899_p6 }
  0x14   :  { %p902_p9 = pnand %p901_p8, %p895_p5 }
  0x16   :  { %905 = shalt.err (!%p902_p9)
}
  0x17   :  { %34 = dma.hbm_to_vmem [thread:$0]  %s1097_s2, 384, %s29_s16, [#allocation3], %s976_s18, %s976_s18, %s977_s19  }
  0x18   :  { %s978_s25 = smov [#allocation7]  }
  0x19   :  { %s56_s26 = sshll.u32 %s978_s25, 4  ;;  %s57_s26 = int_to_ptr.vmem [resolvable:$true] %s56_s26 }
  0x1a   :  { %s914_s27 = scalar_lea.vmem %s57_s26, 2048  ;;  %p919_p11 = scmp.lt.s32.totalorder %s57_s26, %s57_s26 }
  0x1b   :  { %p915_p10 = scmp.ne.s32.totalorder %s57_s26, %s914_s27  ;;  %p920_p12 = scmp.lt.s32.totalorder %s914_s27, %s914_s27 }
  0x1d   :  { %p921_p13 = por %p920_p12, %p919_p11 }
  0x1f   :  { %p922_p0 = pnand %p921_p13, %p915_p10 }
  0x21   :  { %925 = shalt.err (!%p922_p0)
}
  0x22   :  { %s979_s4 = smov 128   ;;  %s980_s28 = smov 8  }
  0x23   :  { %62 = dma.hbm_to_vmem [thread:$0]  %s1101_s6, 2048, %s57_s26, [#allocation6], %s979_s4, %s979_s4, %s980_s28  }
  0x24   :  { %s981_s2 = smov [#allocation8]  }
  0x25   :  { %s70_s11 = sshll.u32 %s981_s2, 4  ;;  %s71_s11 = int_to_ptr.vmem [resolvable:$true] %s70_s11 }
  0x26   :  { %s934_s12 = scalar_lea.vmem %s71_s11, 2048  ;;  %p939_p2 = scmp.lt.s32.totalorder %s71_s11, %s71_s11 }
  0x27   :  { %p935_p1 = scmp.ne.s32.totalorder %s71_s11, %s934_s12  ;;  %p940_p3 = scmp.lt.s32.totalorder %s934_s12, %s934_s12 }
  0x29   :  { %p941_p4 = por %p940_p3, %p939_p2 }
  0x2b   :  { %p942_p5 = pnand %p941_p4, %p935_p1 }
  0x2d   :  { %945 = shalt.err (!%p942_p5)
}
  0x2e   :  { %76 = dma.hbm_to_vmem [thread:$0]  %s1103_s8, 2048, %s71_s11, [#allocation9], %s976_s18, %s976_s18, %s977_s19  }
  0x2f   :  { %966 = dma.done.wait [#allocation3], 384  }
  0x30   :  { %967 = vsyncadd [#allocation3], 4294966912 }
  0x31   :  { %968 = dma.done.wait [#allocation6], 3072  }
  0x32   :  { %969 = vsyncadd [#allocation6], 4294964224 }
  0x33   :  { %970 = dma.done.wait [#allocation9], 2048  }
  0x34   :  { %971 = vsyncadd [#allocation9], 4294965248  ;;  %v982_v0 = vmov 0   ;;  %v983_v1 = vmov 0.0   ;;  %v92_v2 = vld [vmem:[%s1095_s0] sm:$0xff]  ;;  %v93_v3 = vld [vmem:[%s1095_s0 + $0x8] sm:$0xff]  ;;  %v94_v10 = vlaneseq }
  0x35   :  { %797 = vset.pattern.permute.xlu0 %v982_v0  ;;  %754 = vmatprep.subr.bf16.mxu0 %v983_v1  ;;  %v798_v4 = vld [vmem:[%s1096_s1] sm:$0xff]   ;;  %v799_v5 = vld [vmem:[#allocation2 + $0x10] sm:$0xff]   ;;  %s984_s19 = smov 16   ;;  %v800_v6 = vld [vmem:[#allocation2 + $0x8] sm:$0xff]   ;;  %vm985_vm0 = vmmov 0   ;;  %vm118_vm3 = vcmask 130048  }
  0x36   :  { %764 = vmatprep.subr.bf16.mxu1 %v983_v1  ;;  %97 = vperm.xlu0 %797, %v92_v2   ;;  %v801_v7 = vld [vmem:[#allocation2] sm:$0xff]   ;;  %v802_v8 = vld [vmem:[#allocation5 + $0x38] sm:$0xff]   ;;  %v803_v9 = vld [vmem:[#allocation5 + $0x30] sm:$0xff]   ;;  %v95_v11 = vand.u32 127, %v94_v10  ;;  %vm153_vm4 = vcmask 392192   ;;  %s986_s23 = smov [#allocation10]  }
  0x37   :  { %116 = vrot.lane.b32.xlu1 %v798_v4, %s984_s19  ;;  %755 = vmatpush3.bf16.msra.mxu0 %v799_v5  ;;  %v804_v19 = vld [vmem:[#allocation5 + $0x28] sm:$0xff]   ;;  %v805_v20 = vld [vmem:[#allocation5 + $0x20] sm:$0xff]   ;;  %v806_v21 = vld [vmem:[#allocation5 + $0x18] sm:$0xff]   ;;  %s655_s24 = sshll.u32 %s986_s23, 4  ;;  %s656_s24 = int_to_ptr.vmem [resolvable:$true] %s655_s24 }
  0x38   :  { %756 = vmatprep.subr.bf16.mxu0 %v983_v1  ;;  %760 = vmatprep.mubr.msk.bf16.mxu0 %vm985_vm0, %v983_v1  ;;  %v807_v22 = vld [vmem:[#allocation5 + $0x10] sm:$0xff]   ;;  %v808_v23 = vld [vmem:[#allocation5 + $0x8] sm:$0xff]   ;;  %v809_v24 = vld [vmem:[#allocation5] sm:$0xff]   ;;  %s946_s25 = scalar_lea.vmem %s656_s24, 256  ;;  %p951_p7 = scmp.lt.s32.totalorder %s656_s24, %s656_s24 }
  0x39   :  { %780 = vmatprep.mubr.msk.bf16.mxu1 %vm985_vm0, %v983_v1  ;;  %765 = vmatpush3.bf16.msra.mxu1 %v802_v8  ;;  %v810_v25 = vld [vmem:[#allocation7 + $0x70] ss:$8 sps:$4 sm:$0xff]   ;;  %v812_v26 = vld [vmem:[#allocation7 + $0x74] ss:$8 sps:$4 sm:$0xff]   ;;  %v815_v27 = vld [vmem:[#allocation7 + $0x64] ss:$8 sps:$4 sm:$0xff]   ;;  %p947_p6 = scmp.ne.s32.totalorder %s656_s24, %s946_s25  ;;  %p952_p8 = scmp.lt.s32.totalorder %s946_s25, %s946_s25 }
  0x3a   :  { %100 = vperm.xlu0 %797, %v93_v3   ;;  %766 = vmatprep.subr.bf16.mxu1 %v983_v1  ;;  %v813_v28 = vld [vmem:[#allocation7 + $0x60] ss:$8 sps:$4 sm:$0xff]   ;;  %v818_v29 = vld [vmem:[#allocation7 + $0x54] ss:$8 sps:$4 sm:$0xff]   ;;  %v816_v30 = vld [vmem:[#allocation7 + $0x50] ss:$8 sps:$4 sm:$0xff]  }
  0x3b   :  { %757 = vmatpush3.bf16.msra.mxu0 %v800_v6  ;;  %v672_v31 = vld [vmem:[%s1098_s3] ss:$0 sm:$0xff]  ;;  %v821_v41 = vld [vmem:[#allocation7 + $0x44] ss:$8 sps:$4 sm:$0xff]   ;;  %v824_v43 = vld [vmem:[#allocation7 + $0x34] ss:$8 sps:$4 sm:$0xff]   ;;  %p953_p9 = por %p952_p8, %p951_p7 }
  0x3c   :  { %758 = vmatprep.subr.bf16.mxu0 %v983_v1  ;;  %v819_v42 = vld [vmem:[#allocation7 + $0x40] ss:$8 sps:$4 sm:$0xff]   ;;  %v822_v44 = vld [vmem:[#allocation7 + $0x30] ss:$8 sps:$4 sm:$0xff]   ;;  %v827_v45 = vld [vmem:[#allocation7 + $0x24] ss:$8 sps:$4 sm:$0xff]  }
  0x3d   :  { %767 = vmatpush3.bf16.msra.mxu1 %v803_v9  ;;  %v825_v46 = vld [vmem:[#allocation7 + $0x20] ss:$8 sps:$4 sm:$0xff]   ;;  %v830_v47 = vld [vmem:[#allocation7 + $0x14] ss:$8 sps:$4 sm:$0xff]   ;;  %v828_v48 = vld [vmem:[#allocation7 + $0x10] ss:$8 sps:$4 sm:$0xff]   ;;  %p954_p10 = pnand %p953_p9, %p947_p6 }
  0x3e   :  { %768 = vmatprep.subr.bf16.mxu1 %v983_v1  ;;  %v833_v49 = vld [vmem:[#allocation7 + $0x4] ss:$8 sps:$4 sm:$0xff]   ;;  %v831_v50 = vld [vmem:[#allocation7] ss:$8 sps:$4 sm:$0xff]   ;;  %v834_v51 = vld [vmem:[#allocation8 + $0x78] sm:$0xff]  }
  0x3f   :  { %759 = vmatpush3.bf16.msra.mxu0 %v801_v7  ;;  %v835_v52 = vld [vmem:[#allocation8 + $0x38] sm:$0xff]   ;;  %v836_v53 = vld [vmem:[#allocation8 + $0x70] sm:$0xff]   ;;  %v677_v55 = vld [vmem:[%s1100_s5] ss:$0 sm:$0xff] }
  0x40   :  { %423 = vmatprep.subr.bf16.mxu0 %v812_v26  ;;  %v837_v54 = vld [vmem:[#allocation8 + $0x30] sm:$0xff]   ;;  %v839_v2 = vld [vmem:[#allocation8 + $0x28] sm:$0xff]   ;;  %v840_v3 = vld [vmem:[#allocation8 + $0x60] sm:$0xff]  }
  0x41   :  { %769 = vmatpush3.bf16.msra.mxu1 %v804_v19  ;;  %v841_v4 = vld [vmem:[#allocation8 + $0x20] sm:$0xff]   ;;  %v842_v5 = vld [vmem:[#allocation8 + $0x58] sm:$0xff]   ;;  %v844_v7 = vld [vmem:[#allocation8 + $0x50] sm:$0xff]  }
  0x42   :  { %770 = vmatprep.subr.bf16.mxu1 %v983_v1  ;;  %v843_v6 = vld [vmem:[#allocation8 + $0x18] sm:$0xff]   ;;  %v845_v8 = vld [vmem:[#allocation8 + $0x10] sm:$0xff]   ;;  %v846_v9 = vld [vmem:[#allocation8 + $0x48] sm:$0xff]  }
  0x45   :  { %771 = vmatpush3.bf16.msra.mxu1 %v805_v20 }
  0x46   :  { %772 = vmatprep.subr.bf16.mxu1 %v983_v1 }
  0x49   :  { %773 = vmatpush3.bf16.msra.mxu1 %v806_v21 }
  0x4a   :  { %774 = vmatprep.subr.bf16.mxu1 %v983_v1 }
  0x4d   :  { %775 = vmatpush3.bf16.msra.mxu1 %v807_v22 }
  0x4e   :  { %776 = vmatprep.subr.bf16.mxu1 %v983_v1 }
  0x51   :  { %777 = vmatpush3.bf16.msra.mxu1 %v808_v23 }
  0x52   :  { %778 = vmatprep.subr.bf16.mxu1 %v983_v1 }
  0x55   :  { %779 = vmatpush3.bf16.msra.mxu1 %v809_v24 }
  0x56   :  { %732 = vmatprep.subr.bf16.mxu1 %v834_v51 }
  0xa9   :  { %v117_v16 = vpop.permute.xlu1 %116 }
  0xb1   :  { %v98_v12 = vpop.permute.xlu0 %97 }
  0xb2   :  { %vm102_vm1 = vcmp.eq.s32.totalorder %v95_v11, %v98_v12  ;;  %v848_v12 = vld [vmem:[#allocation8 + $0x40] sm:$0xff]  }
  0xb3   :  { %v669_v14 = vsel %vm102_vm1, 1.0, %v983_v1 }
  0xb5   :  { %v101_v13 = vpop.permute.xlu0 %100 }
  0xb6   :  { %vm103_vm2 = vcmp.eq.s32.totalorder %v95_v11, %v101_v13  ;;  %v847_v11 = vld [vmem:[#allocation8 + $0x8] sm:$0xff]   ;;  %v849_v13 = vld [vmem:[#allocation8] sm:$0xff]  }
  0xb7   :  { %v670_v15 = vsel %vm103_vm2, 1.0, %v983_v1  ;;  %v838_v1 = vld [vmem:[#allocation8 + $0x68] sm:$0xff]  }
  0xb8   :  { %v108_v17 = vpack.c.bf16 %v670_v15, %v669_v14  ;;  %v334_v14 = vshrl.u32 %v94_v10, 7 }
  0xba   :  { %v121_v18 = vsel %vm118_vm3, %v108_v17, %v117_v16  ;;  %v339_v15 = vsub.s32 1, %v334_v14  ;;  %v331_v16 = vld [vmem:[%s1102_s7] sm:$0x3]  ;;  %v335_v17 = vsub.s32 0, %v334_v14 }
  0xbb   :  { %761 = vmatmul.mubr.msk.bf16.vlgmr.msra.gmra.mxu0 %vm153_vm4, %v121_v18 }
  0xbc   :  { %455 = vmatprep.mubr.bf16.mxu0 %v982_v0  ;;  %424 = vmatpush1.bf16.msra.mxu0 %v810_v25  ;;  %v340_v18 = vrot.slane %v331_v16, %v339_v15  ;;  %v336_v20 = vrot.slane %v331_v16, %v335_v17 }
  0xbd   :  { %425 = vmatprep.subr.bf16.mxu0 %v815_v27 }
  0xc0   :  { %426 = vmatpush1.bf16.msra.mxu0 %v813_v28 }
  0xc1   :  { %427 = vmatprep.subr.bf16.mxu0 %v818_v29 }
  0xc4   :  { %428 = vmatpush1.bf16.msra.mxu0 %v816_v30 }
  0xc5   :  { %429 = vmatprep.subr.bf16.mxu0 %v821_v41 }
  0xc8   :  { %430 = vmatpush1.bf16.msra.mxu0 %v819_v42 }
  0xc9   :  { %431 = vmatprep.subr.bf16.mxu0 %v824_v43 }
  0xcc   :  { %432 = vmatpush1.bf16.msra.mxu0 %v822_v44 }
  0xcd   :  { %433 = vmatprep.subr.bf16.mxu0 %v827_v45 }
  0xd0   :  { %434 = vmatpush1.bf16.msra.mxu0 %v825_v46 }
  0xd1   :  { %435 = vmatprep.subr.bf16.mxu0 %v830_v47 }
  0xd4   :  { %436 = vmatpush1.bf16.msra.mxu0 %v828_v48 }
  0xd5   :  { %437 = vmatprep.subr.bf16.mxu0 %v833_v49 }
  0xd8   :  { %438 = vmatpush1.bf16.msra.mxu0 %v831_v50 }
 0x17b   :  { %v190_v32 = vpop.f32.mrf.mxu0 }
 0x17c   :  { %v191_v33 = vadd.f32 %v672_v31, %v190_v32 }
 0x17d   :  { %v762_v34 = vpop.f32.mrf.mxu0 }
 0x17e   :  { %850 = vtanh.f32 %v191_v33  ;;  %v702_v34 = vld [vmem:[%s1104_s9] ss:$0 sm:$0xff] }
 0x17f   :  { %v193_v35 = vpop.f32.mrf.mxu0 }
 0x180   :  { %v194_v36 = vadd.f32 %v672_v31, %v193_v35 }
 0x181   :  { %v763_v37 = vpop.f32.mrf.mxu0 }
 0x182   :  { %852 = vtanh.f32 %v194_v36 }
 0x18b   :  { %v851_v38 = vpop.eup %850 }
 0x18f   :  { %v853_v39 = vpop.eup %852 }
 0x190   :  { %v199_v40 = vpack.c.bf16 %v853_v39, %v851_v38 }
 0x192   :  { %781 = vmatmul.mubr.bf16.vlgmr.msra.gmra.mxu1 %v199_v40 }
 0x193   :  { %733 = vmatpush3.bf16.msra.mxu1 %v835_v52 }
 0x194   :  { %734 = vmatprep.subr.bf16.mxu1 %v836_v53 }
 0x197   :  { %735 = vmatpush3.bf16.msra.mxu1 %v837_v54 }
 0x198   :  { %736 = vmatprep.subr.bf16.mxu1 %v838_v1 }
 0x19b   :  { %737 = vmatpush3.bf16.msra.mxu1 %v839_v2 }
 0x19c   :  { %738 = vmatprep.subr.bf16.mxu1 %v840_v3 }
 0x19f   :  { %739 = vmatpush3.bf16.msra.mxu1 %v841_v4 }
 0x1a0   :  { %740 = vmatprep.subr.bf16.mxu1 %v842_v5 }
 0x1a3   :  { %741 = vmatpush3.bf16.msra.mxu1 %v843_v6 }
 0x1a4   :  { %742 = vmatprep.subr.bf16.mxu1 %v844_v7 }
 0x1a7   :  { %743 = vmatpush3.bf16.msra.mxu1 %v845_v8 }
 0x1a8   :  { %744 = vmatprep.subr.bf16.mxu1 %v846_v9 }
 0x1ab   :  { %745 = vmatpush3.bf16.msra.mxu1 %v847_v11 }
 0x1ac   :  { %746 = vmatprep.subr.bf16.mxu1 %v848_v12 }
 0x1af   :  { %747 = vmatpush3.bf16.msra.mxu1 %v849_v13 }
 0x252   :  { %v305_v56 = vpop.f32.mrf.mxu1 }
 0x253   :  { %v306_v57 = vadd.f32 %v677_v55, %v305_v56 }
 0x254   :  { %v782_v58 = vpop.f32.mrf.mxu1 }
 0x255   :  { %854 = vtanh.f32 %v306_v57 }
 0x256   :  { %v308_v59 = vpop.f32.mrf.mxu1 }
 0x257   :  { %v309_v60 = vadd.f32 %v677_v55, %v308_v59 }
 0x258   :  { %v783_v61 = vpop.f32.mrf.mxu1 }
 0x259   :  { %856 = vtanh.f32 %v309_v60 }
 0x262   :  { %v855_v62 = vpop.eup %854 }
 0x266   :  { %v857_v63 = vpop.eup %856 }
 0x267   :  { %v314_v0 = vpack.c.bf16 %v857_v63, %v855_v62 }
 0x269   :  { %456 = vmatmul.mubr.bf16.vlgmr.msra.gmra.mxu0 %v314_v0 }
 0x329   :  { %v457_v19 = vpop.f32.mrf.mxu0 }
 0x32a   :  { %v458_v25 = vadd.f32 %v457_v19, %v336_v20 }
 0x32b   :  { %v459_v21 = vpop.f32.mrf.mxu0 }
 0x32c   :  { %v460_v22 = vadd.f32 %v459_v21, %v340_v18 }
 0x32d   :  { %v461_v23 = vpop.f32.mrf.mxu0 }
 0x32e   :  { %v462_v24 = vadd.f32 %v461_v23, %v336_v20  ;;  %858 = vtanh.f32 %v460_v22 }
 0x32f   :  { %v463_v26 = vpop.f32.mrf.mxu0 }
 0x330   :  { %v464_v27 = vadd.f32 %v463_v26, %v340_v18  ;;  %860 = vtanh.f32 %v462_v24 }
 0x332   :  { %862 = vtanh.f32 %v464_v27 }
 0x333   :  { %864 = vtanh.f32 %v458_v25 }
 0x33b   :  { %v859_v10 = vpop.eup %858 }
 0x33d   :  { %v861_v28 = vpop.eup %860 }
 0x33f   :  { %v863_v29 = vpop.eup %862 }
 0x340   :  { %v865_v30 = vpop.eup %864  ;;  %v471_v31 = vpack.c.bf16 %v863_v29, %v859_v10 }
 0x341   :  { %v470_v32 = vpack.c.bf16 %v861_v28, %v865_v30 }
 0x342   :  { %639 = vmatprep.mubr.bf16.mxu1 %v471_v31 }
 0x343   :  { %640 = vmatmul.mubr.bf16.vlgmr.msra.gmra.mxu1 %v470_v32 }
 0x403   :  { %v748_v33 = vpop.f32.mrf.mxu1 }
 0x405   :  { %v749_v35 = vpop.f32.mrf.mxu1 }
 0x406   :  { %v750_v36 = vadd.f32 %v749_v35, %v748_v33 }
 0x407   :  { %v751_v37 = vpop.f32.mrf.mxu1 }
 0x408   :  { %v642_v38 = vadd.f32 %v750_v36, %v702_v34 }
 0x409   :  { %v752_v39 = vpop.f32.mrf.mxu1 }
 0x40a   :  { %648 = vst [vmem:[#allocation10] sm:$0xff] %v642_v38  ;;  %v753_v40 = vadd.f32 %v752_v39, %v751_v37 }
 0x40c   :  { %v645_v41 = vadd.f32 %v753_v40, %v702_v34 }
 0x40e   :  { %649 = vst [vmem:[#allocation10 + $0x8] sm:$0xff] %v645_v41 }
 0x40f   :  { %957 = shalt.err (!%p954_p10)
}
 0x410   :  { %661 = dma.vmem_to_hbm [thread:$0]  %s656_s24, 256, %s1105_s10, [#allocation4], %s979_s4, %s979_s4, %s980_s28  }
 0x411   :  { %972 = dma.done.wait [#allocation4], 256  }
 0x412   :  { %973 = vsyncadd [#allocation4], 4294967040 }
 0x413   :  { %665 = vsyncpa [#allocation3], 1 }
 0x414   :  { %666 = vsyncpa [#allocation6], 1 }
 0x415   :  { %667 = vsyncpa [#allocation9], 1 }
 0x416   :  { %668 = vsyncpa [#allocation4], 1 }

</bundles_post_ra>
